<compile_context>
chip_gen: v7x
topology: tpu7x:2x2x1
jax: 0.10.0
libtpu: 0.0.40
codegen_flags: <defaults>
</compile_context>

<pallas_src>
import functools

import jax
import jax.numpy as jnp
from jax.experimental import pallas as pl
from jax.experimental.pallas import tpu as pltpu


# ----------------------------- fused Pallas kernel -----------------------------
def fused_kernel(tok_ref, embwih_ref, whh_ref, bias_ref, band_ref, bct_ref,
                 out_ref, *, S, Bp, H, F, L):
    """Single invocation: all branches merged into the B' (= Bp) row axis.

    tok_ref    : (S*Bp, 1) int32   tokens, t-major (row r = t*Bp + b)
    embwih_ref : (V, 4H)           emb @ W_ih^T (embedding fused into input proj)
    whh_ref    : (H, 4H)           W_hh^T (gate order i, f, g, o)
    bias_ref   : (1, 4H)           b_ih + b_hh
    band_ref   : (S*H, L*F)        banded conv weight: block (s, l) = wc[s - l]
    bct_ref    : (1, L*F)          conv bias tiled over the L positions
    out_ref    : (Bp, F)           pooled output (rows beyond 3*B are padding)
    """
    V = embwih_ref.shape[0]

    # ---- input projection for every (step, row): ONE MXU push, bias folded ----
    tok = tok_ref[...]                                          # (S*Bp, 1) int32
    iota_v = jax.lax.broadcasted_iota(jnp.int32, (S * Bp, V), 1)
    onehot = (iota_v == tok).astype(jnp.float32)                # (S*Bp, V)
    x_all = (jnp.dot(onehot, embwih_ref[...],
                     preferred_element_type=jnp.float32)
             + bias_ref[...])                                   # (S*Bp, 4H)

    whh = whh_ref[...]                                          # (H, 4H)
    # Lane mask selecting the g-gate lanes (tanh); i/f/o lanes use sigmoid.
    lane = jax.lax.broadcasted_iota(jnp.int32, (Bp, 4 * H), 1)
    g_lanes = (lane >= 2 * H) & (lane < 3 * H)

    h = jnp.zeros((Bp, H), jnp.float32)
    c = jnp.zeros((Bp, H), jnp.float32)
    hs = []
    for t in range(S):                  # static unroll; 1 serialized MXU push / step
        gates = x_all[t * Bp:(t + 1) * Bp, :] + jnp.dot(
            h, whh, preferred_element_type=jnp.float32)         # (Bp, 4H)
        # Two full-width EUP sweeps + one VPU select instead of 4 sliced activations.
        act = jnp.where(g_lanes, jnp.tanh(gates), jax.nn.sigmoid(gates))
        i_g = act[:, 0:H]
        f_g = act[:, H:2 * H]
        g_g = act[:, 2 * H:3 * H]
        o_g = act[:, 3 * H:4 * H]
        c = f_g * c + i_g * g_g
        h = o_g * jnp.tanh(c)
        hs.append(h)

    # ---- Conv2d + bias + tanh + max-pool as one matmul vs. the banded weight ----
    hist = jnp.concatenate(hs, axis=1)                          # (Bp, S*H)
    pre = (jnp.dot(hist, band_ref[...],
                   preferred_element_type=jnp.float32)
           + bct_ref[...])                                      # (Bp, L*F)
    vals = jnp.tanh(pre)
    pooled = vals[:, 0:F]
    for l in range(1, L):                                       # max-pool over width
        pooled = jnp.maximum(pooled, vals[:, l * F:(l + 1) * F])
    out_ref[...] = pooled


def fused_forward(tok_flat, emb_wih, whh_t, bias, band2, bct2, *, S, Bp, H, F, L):
    V = emb_wih.shape[0]
    SH = band2.shape[0]
    kernel = functools.partial(fused_kernel, S=S, Bp=Bp, H=H, F=F, L=L)
    grid_spec = pltpu.PrefetchScalarGridSpec(
        num_scalar_prefetch=0,
        grid=(1,),                                              # single grid step
        in_specs=[
            pl.BlockSpec((S * Bp, 1), lambda i: (0, 0)),        # tokens (t-major)
            pl.BlockSpec((V, 4 * H), lambda i: (0, 0)),         # emb @ W_ih^T
            pl.BlockSpec((H, 4 * H), lambda i: (0, 0)),         # W_hh^T
            pl.BlockSpec((1, 4 * H), lambda i: (0, 0)),         # LSTM bias
            pl.BlockSpec((SH, L * F), lambda i: (0, 0)),        # banded conv weight
            pl.BlockSpec((1, L * F), lambda i: (0, 0)),         # tiled conv bias
        ],
        out_specs=pl.BlockSpec((Bp, F), lambda i: (0, 0)),
    )
    return pl.pallas_call(
        kernel,
        out_shape=jax.ShapeDtypeStruct((Bp, F), jnp.float32),
        grid_spec=grid_spec,
        compiler_params=pltpu.CompilerParams(
            dimension_semantics=("arbitrary",)),
    )(tok_flat, emb_wih, whh_t, bias, band2, bct2)


# ------------------------------- Model wrapper --------------------------------
def init_params(key, vocab_size, emb_dim, hidden, n_filters, window, seq_len):
    ks = jax.random.split(key, 7)
    scale = 0.1
    emb = scale * jax.random.normal(ks[0], (vocab_size, emb_dim), jnp.float32)
    w_ih = scale * jax.random.normal(ks[1], (4 * hidden, emb_dim), jnp.float32)
    w_hh = scale * jax.random.normal(ks[2], (4 * hidden, hidden), jnp.float32)
    b_ih = scale * jax.random.normal(ks[3], (4 * hidden,), jnp.float32)
    b_hh = scale * jax.random.normal(ks[4], (4 * hidden,), jnp.float32)
    # PyTorch Conv2d weight: (n_filters, 1, hidden, window)
    conv_w = scale * jax.random.normal(ks[5], (n_filters, 1, hidden, window), jnp.float32)
    conv_b = scale * jax.random.normal(ks[6], (n_filters,), jnp.float32)

    # Algebraic fusion: embedding folded into the LSTM input projection.
    emb_wih = emb @ w_ih.T                                      # (V, 4H)

    # Banded conv weight: band[s*H + h, l, f] = conv_w[f, 0, h, s - l] for 0 <= s-l < W.
    L = seq_len - window + 1
    wc = jnp.transpose(conv_w[:, 0], (2, 1, 0))                 # (W, H, F)
    band = jnp.zeros((seq_len * hidden, L, n_filters), jnp.float32)
    for l in range(L):
        for w in range(window):
            s = l + w
            band = band.at[s * hidden:(s + 1) * hidden, l, :].set(wc[w])

    return {
        "emb_wih": emb_wih,                                     # (V, 4H)
        "whh_t": w_hh.T,                                        # (H, 4H)
        "bias": (b_ih + b_hh).reshape(1, 4 * hidden),           # (1, 4H)
        "band": band,                                           # (S*H, L, F)
        "bc_tiled": jnp.tile(conv_b.reshape(1, 1, n_filters), (1, L, 1)),  # (1, L, F)
    }


@jax.jit
def my_rnn_cnn_forward(question, c_answers, n_answers, params):
    # isvalid=False path: all three (len x batch) sequences folded into the
    # batch axis of a SINGLE pallas_call; result split back into q/a/n.
    tokens = jnp.concatenate(
        [question, c_answers, n_answers], axis=1).astype(jnp.int32)   # (S, 3B)
    S, B3 = tokens.shape
    pad = (-B3) % 8                                 # pad rows to full sublane groups
    if pad:
        tokens = jnp.pad(tokens, ((0, 0), (0, pad)))
    Bp = B3 + pad
    tok_flat = tokens.reshape(S * Bp, 1)            # t-major: row r = t*Bp + b

    band3 = params["band"]                          # (S*H, L, F)
    SH, L, F_ = band3.shape
    H = params["whh_t"].shape[0]
    band2 = band3.reshape(SH, L * F_)
    bct2 = params["bc_tiled"].reshape(1, L * F_)

    out = fused_forward(tok_flat, params["emb_wih"], params["whh_t"],
                        params["bias"], band2, bct2,
                        S=S, Bp=Bp, H=H, F=F_, L=L)             # (Bp, F)

    B = question.shape[1]
    return out[0:B], out[B:2 * B], out[2 * B:3 * B]


# ----------------------------------- main --------------------------------------
if __name__ == "__main__":
    vocab_size, emb_dim, hidden, n_filters, window = 50, 16, 32, 8, 3
    seq_len, batch = 8, 2

    key = jax.random.PRNGKey(0)
    kp, kq, ka, kn = jax.random.split(key, 4)
    params = init_params(kp, vocab_size, emb_dim, hidden, n_filters, window, seq_len)

    question = jax.random.randint(kq, (seq_len, batch), 0, vocab_size, jnp.int32)
    c_answers = jax.random.randint(ka, (seq_len, batch), 0, vocab_size, jnp.int32)
    n_answers = jax.random.randint(kn, (seq_len, batch), 0, vocab_size, jnp.int32)
    # lengths: full sequence for every batch element (see TODO about packing above).
    lengths = jnp.full((batch,), seq_len, jnp.int32)  # noqa: F841

    q_out, a_out, n_out = my_rnn_cnn_forward(question, c_answers, n_answers, params)
    jax.block_until_ready((q_out, a_out, n_out))

    assert q_out.shape == (batch, n_filters)
    assert a_out.shape == (batch, n_filters)
    assert n_out.shape == (batch, n_filters)
    assert q_out.dtype == jnp.float32

    print("KERNEL_OK")
</pallas_src>

<mosaic_0001>
module attributes {stable_mosaic.version = 11 : i64} {
  func.func @fused_kernel(%arg0: i32, %arg1: memref<64x1xi32, #tpu.memory_space<vmem>>, %arg2: memref<50x128xf32, #tpu.memory_space<vmem>>, %arg3: memref<32x128xf32, #tpu.memory_space<vmem>>, %arg4: memref<1x128xf32, #tpu.memory_space<vmem>>, %arg5: memref<256x48xf32, #tpu.memory_space<vmem>>, %arg6: memref<1x48xf32, #tpu.memory_space<vmem>>, %arg7: memref<8x8xf32, #tpu.memory_space<vmem>>) attributes {dimension_semantics = [#tpu.dimension_semantics<arbitrary>], iteration_bounds = array<i64: 1>, scalar_prefetch = 0 : i64, scratch_operands = 0 : i64, tpu.core_type = #tpu.core_type<tc>, window_params = [{pipeline_mode = #tpu.pipeline_mode<synchronous>, transform_indices = @transform_0, window_bounds = array<i64: 64, 1>}, {pipeline_mode = #tpu.pipeline_mode<synchronous>, transform_indices = @transform_1, window_bounds = array<i64: 50, 128>}, {pipeline_mode = #tpu.pipeline_mode<synchronous>, transform_indices = @transform_2, window_bounds = array<i64: 32, 128>}, {pipeline_mode = #tpu.pipeline_mode<synchronous>, transform_indices = @transform_3, window_bounds = array<i64: 1, 128>}, {pipeline_mode = #tpu.pipeline_mode<synchronous>, transform_indices = @transform_4, window_bounds = array<i64: 256, 48>}, {pipeline_mode = #tpu.pipeline_mode<synchronous>, transform_indices = @transform_5, window_bounds = array<i64: 1, 48>}, {pipeline_mode = #tpu.pipeline_mode<synchronous>, transform_indices = @transform_6, window_bounds = array<i64: 8, 8>}]} {
    %c0 = arith.constant 0 : index
    %c0_0 = arith.constant 0 : index
    %0 = vector.load %arg1[%c0, %c0_0] : memref<64x1xi32, #tpu.memory_space<vmem>>, vector<64x1xi32>
    %1 = tpu.iota {dimensions = array<i32: 1>} : vector<64x50xi32>
    %2 = vector.broadcast %0 : vector<64x1xi32> to vector<64x50xi32>
    %3 = arith.cmpi eq, %1, %2 : vector<64x50xi32>
    %4 = arith.extui %3 : vector<64x50xi1> to vector<64x50xi32>
    %5 = arith.sitofp %4 : vector<64x50xi32> to vector<64x50xf32>
    %c0_1 = arith.constant 0 : index
    %c0_2 = arith.constant 0 : index
    %6 = vector.load %arg2[%c0_1, %c0_2] : memref<50x128xf32, #tpu.memory_space<vmem>>, vector<50x128xf32>
    %cst = arith.constant dense<0.000000e+00> : vector<64x128xf32>
    %7 = tpu.matmul %5, %6, %cst {dimension_numbers = #tpu.dot_dimension_numbers<[1], [0], [0], [1], [0, 0, 1, 1], [], []>} : vector<64x50xf32>, vector<50x128xf32>, vector<64x128xf32> -> vector<64x128xf32>
    %c0_3 = arith.constant 0 : index
    %c0_4 = arith.constant 0 : index
    %8 = vector.load %arg4[%c0_3, %c0_4] : memref<1x128xf32, #tpu.memory_space<vmem>>, vector<1x128xf32>
    %9 = vector.broadcast %8 : vector<1x128xf32> to vector<64x128xf32>
    %10 = arith.addf %7, %9 : vector<64x128xf32>
    %c0_5 = arith.constant 0 : index
    %c0_6 = arith.constant 0 : index
    %11 = vector.load %arg3[%c0_5, %c0_6] : memref<32x128xf32, #tpu.memory_space<vmem>>, vector<32x128xf32>
    %12 = tpu.iota {dimensions = array<i32: 1>} : vector<8x128xi32>
    %c64_i32 = arith.constant 64 : i32
    %13 = vector.broadcast %c64_i32 : i32 to vector<8x128xi32>
    %14 = arith.cmpi sge, %12, %13 : vector<8x128xi32>
    %c96_i32 = arith.constant 96 : i32
    %15 = vector.broadcast %c96_i32 : i32 to vector<8x128xi32>
    %16 = arith.cmpi slt, %12, %15 : vector<8x128xi32>
    %17 = arith.andi %14, %16 : vector<8x128xi1>
    %cst_7 = arith.constant 0.000000e+00 : f32
    %18 = vector.broadcast %cst_7 : f32 to vector<8x32xf32>
    %cst_8 = arith.constant 0.000000e+00 : f32
    %19 = vector.broadcast %cst_8 : f32 to vector<8x32xf32>
    %20 = vector.extract_strided_slice %10 {offsets = [0, 0], sizes = [8, 128], strides = [1, 1]} : vector<64x128xf32> to vector<8x128xf32>
    %cst_9 = arith.constant dense<0.000000e+00> : vector<8x128xf32>
    %21 = tpu.matmul %18, %11, %cst_9 {dimension_numbers = #tpu.dot_dimension_numbers<[1], [0], [0], [1], [0, 0, 1, 1], [], []>} : vector<8x32xf32>, vector<32x128xf32>, vector<8x128xf32> -> vector<8x128xf32>
    %22 = arith.addf %20, %21 : vector<8x128xf32>
    %23 = math.tanh %22 : vector<8x128xf32>
    %24 = arith.negf %22 : vector<8x128xf32>
    %25 = math.exp %24 : vector<8x128xf32>
    %cst_10 = arith.constant 1.000000e+00 : f32
    %26 = vector.broadcast %cst_10 : f32 to vector<8x128xf32>
    %27 = arith.addf %26, %25 : vector<8x128xf32>
    %28 = arith.divf %26, %27 : vector<8x128xf32>
    %29 = arith.select %17, %23, %28 : vector<8x128xi1>, vector<8x128xf32>
    %30 = vector.extract_strided_slice %29 {offsets = [0, 0], sizes = [8, 32], strides = [1, 1]} : vector<8x128xf32> to vector<8x32xf32>
    %31 = vector.extract_strided_slice %29 {offsets = [0, 32], sizes = [8, 32], strides = [1, 1]} : vector<8x128xf32> to vector<8x32xf32>
    %32 = vector.extract_strided_slice %29 {offsets = [0, 64], sizes = [8, 32], strides = [1, 1]} : vector<8x128xf32> to vector<8x32xf32>
    %33 = vector.extract_strided_slice %29 {offsets = [0, 96], sizes = [8, 32], strides = [1, 1]} : vector<8x128xf32> to vector<8x32xf32>
    %34 = arith.mulf %31, %19 : vector<8x32xf32>
    %35 = arith.mulf %30, %32 : vector<8x32xf32>
    %36 = arith.addf %34, %35 : vector<8x32xf32>
    %37 = math.tanh %36 : vector<8x32xf32>
    %38 = arith.mulf %33, %37 : vector<8x32xf32>
    %39 = vector.extract_strided_slice %10 {offsets = [8, 0], sizes = [8, 128], strides = [1, 1]} : vector<64x128xf32> to vector<8x128xf32>
    %cst_11 = arith.constant dense<0.000000e+00> : vector<8x128xf32>
    %40 = tpu.matmul %38, %11, %cst_11 {dimension_numbers = #tpu.dot_dimension_numbers<[1], [0], [0], [1], [0, 0, 1, 1], [], []>} : vector<8x32xf32>, vector<32x128xf32>, vector<8x128xf32> -> vector<8x128xf32>
    %41 = arith.addf %39, %40 : vector<8x128xf32>
    %42 = math.tanh %41 : vector<8x128xf32>
    %43 = arith.negf %41 : vector<8x128xf32>
    %44 = math.exp %43 : vector<8x128xf32>
    %cst_12 = arith.constant 1.000000e+00 : f32
    %45 = vector.broadcast %cst_12 : f32 to vector<8x128xf32>
    %46 = arith.addf %45, %44 : vector<8x128xf32>
    %47 = arith.divf %45, %46 : vector<8x128xf32>
    %48 = arith.select %17, %42, %47 : vector<8x128xi1>, vector<8x128xf32>
    %49 = vector.extract_strided_slice %48 {offsets = [0, 0], sizes = [8, 32], strides = [1, 1]} : vector<8x128xf32> to vector<8x32xf32>
    %50 = vector.extract_strided_slice %48 {offsets = [0, 32], sizes = [8, 32], strides = [1, 1]} : vector<8x128xf32> to vector<8x32xf32>
    %51 = vector.extract_strided_slice %48 {offsets = [0, 64], sizes = [8, 32], strides = [1, 1]} : vector<8x128xf32> to vector<8x32xf32>
    %52 = vector.extract_strided_slice %48 {offsets = [0, 96], sizes = [8, 32], strides = [1, 1]} : vector<8x128xf32> to vector<8x32xf32>
    %53 = arith.mulf %50, %36 : vector<8x32xf32>
    %54 = arith.mulf %49, %51 : vector<8x32xf32>
    %55 = arith.addf %53, %54 : vector<8x32xf32>
    %56 = math.tanh %55 : vector<8x32xf32>
    %57 = arith.mulf %52, %56 : vector<8x32xf32>
    %58 = vector.extract_strided_slice %10 {offsets = [16, 0], sizes = [8, 128], strides = [1, 1]} : vector<64x128xf32> to vector<8x128xf32>
    %cst_13 = arith.constant dense<0.000000e+00> : vector<8x128xf32>
    %59 = tpu.matmul %57, %11, %cst_13 {dimension_numbers = #tpu.dot_dimension_numbers<[1], [0], [0], [1], [0, 0, 1, 1], [], []>} : vector<8x32xf32>, vector<32x128xf32>, vector<8x128xf32> -> vector<8x128xf32>
    %60 = arith.addf %58, %59 : vector<8x128xf32>
    %61 = math.tanh %60 : vector<8x128xf32>
    %62 = arith.negf %60 : vector<8x128xf32>
    %63 = math.exp %62 : vector<8x128xf32>
    %cst_14 = arith.constant 1.000000e+00 : f32
    %64 = vector.broadcast %cst_14 : f32 to vector<8x128xf32>
    %65 = arith.addf %64, %63 : vector<8x128xf32>
    %66 = arith.divf %64, %65 : vector<8x128xf32>
    %67 = arith.select %17, %61, %66 : vector<8x128xi1>, vector<8x128xf32>
    %68 = vector.extract_strided_slice %67 {offsets = [0, 0], sizes = [8, 32], strides = [1, 1]} : vector<8x128xf32> to vector<8x32xf32>
    %69 = vector.extract_strided_slice %67 {offsets = [0, 32], sizes = [8, 32], strides = [1, 1]} : vector<8x128xf32> to vector<8x32xf32>
    %70 = vector.extract_strided_slice %67 {offsets = [0, 64], sizes = [8, 32], strides = [1, 1]} : vector<8x128xf32> to vector<8x32xf32>
    %71 = vector.extract_strided_slice %67 {offsets = [0, 96], sizes = [8, 32], strides = [1, 1]} : vector<8x128xf32> to vector<8x32xf32>
    %72 = arith.mulf %69, %55 : vector<8x32xf32>
    %73 = arith.mulf %68, %70 : vector<8x32xf32>
    %74 = arith.addf %72, %73 : vector<8x32xf32>
    %75 = math.tanh %74 : vector<8x32xf32>
    %76 = arith.mulf %71, %75 : vector<8x32xf32>
    %77 = vector.extract_strided_slice %10 {offsets = [24, 0], sizes = [8, 128], strides = [1, 1]} : vector<64x128xf32> to vector<8x128xf32>
    %cst_15 = arith.constant dense<0.000000e+00> : vector<8x128xf32>
    %78 = tpu.matmul %76, %11, %cst_15 {dimension_numbers = #tpu.dot_dimension_numbers<[1], [0], [0], [1], [0, 0, 1, 1], [], []>} : vector<8x32xf32>, vector<32x128xf32>, vector<8x128xf32> -> vector<8x128xf32>
    %79 = arith.addf %77, %78 : vector<8x128xf32>
    %80 = math.tanh %79 : vector<8x128xf32>
    %81 = arith.negf %79 : vector<8x128xf32>
    %82 = math.exp %81 : vector<8x128xf32>
    %cst_16 = arith.constant 1.000000e+00 : f32
    %83 = vector.broadcast %cst_16 : f32 to vector<8x128xf32>
    %84 = arith.addf %83, %82 : vector<8x128xf32>
    %85 = arith.divf %83, %84 : vector<8x128xf32>
    %86 = arith.select %17, %80, %85 : vector<8x128xi1>, vector<8x128xf32>
    %87 = vector.extract_strided_slice %86 {offsets = [0, 0], sizes = [8, 32], strides = [1, 1]} : vector<8x128xf32> to vector<8x32xf32>
    %88 = vector.extract_strided_slice %86 {offsets = [0, 32], sizes = [8, 32], strides = [1, 1]} : vector<8x128xf32> to vector<8x32xf32>
    %89 = vector.extract_strided_slice %86 {offsets = [0, 64], sizes = [8, 32], strides = [1, 1]} : vector<8x128xf32> to vector<8x32xf32>
    %90 = vector.extract_strided_slice %86 {offsets = [0, 96], sizes = [8, 32], strides = [1, 1]} : vector<8x128xf32> to vector<8x32xf32>
    %91 = arith.mulf %88, %74 : vector<8x32xf32>
    %92 = arith.mulf %87, %89 : vector<8x32xf32>
    %93 = arith.addf %91, %92 : vector<8x32xf32>
    %94 = math.tanh %93 : vector<8x32xf32>
    %95 = arith.mulf %90, %94 : vector<8x32xf32>
    %96 = vector.extract_strided_slice %10 {offsets = [32, 0], sizes = [8, 128], strides = [1, 1]} : vector<64x128xf32> to vector<8x128xf32>
    %cst_17 = arith.constant dense<0.000000e+00> : vector<8x128xf32>
    %97 = tpu.matmul %95, %11, %cst_17 {dimension_numbers = #tpu.dot_dimension_numbers<[1], [0], [0], [1], [0, 0, 1, 1], [], []>} : vector<8x32xf32>, vector<32x128xf32>, vector<8x128xf32> -> vector<8x128xf32>
    %98 = arith.addf %96, %97 : vector<8x128xf32>
    %99 = math.tanh %98 : vector<8x128xf32>
    %100 = arith.negf %98 : vector<8x128xf32>
    %101 = math.exp %100 : vector<8x128xf32>
    %cst_18 = arith.constant 1.000000e+00 : f32
    %102 = vector.broadcast %cst_18 : f32 to vector<8x128xf32>
    %103 = arith.addf %102, %101 : vector<8x128xf32>
    %104 = arith.divf %102, %103 : vector<8x128xf32>
    %105 = arith.select %17, %99, %104 : vector<8x128xi1>, vector<8x128xf32>
    %106 = vector.extract_strided_slice %105 {offsets = [0, 0], sizes = [8, 32], strides = [1, 1]} : vector<8x128xf32> to vector<8x32xf32>
    %107 = vector.extract_strided_slice %105 {offsets = [0, 32], sizes = [8, 32], strides = [1, 1]} : vector<8x128xf32> to vector<8x32xf32>
    %108 = vector.extract_strided_slice %105 {offsets = [0, 64], sizes = [8, 32], strides = [1, 1]} : vector<8x128xf32> to vector<8x32xf32>
    %109 = vector.extract_strided_slice %105 {offsets = [0, 96], sizes = [8, 32], strides = [1, 1]} : vector<8x128xf32> to vector<8x32xf32>
    %110 = arith.mulf %107, %93 : vector<8x32xf32>
    %111 = arith.mulf %106, %108 : vector<8x32xf32>
    %112 = arith.addf %110, %111 : vector<8x32xf32>
    %113 = math.tanh %112 : vector<8x32xf32>
    %114 = arith.mulf %109, %113 : vector<8x32xf32>
    %115 = vector.extract_strided_slice %10 {offsets = [40, 0], sizes = [8, 128], strides = [1, 1]} : vector<64x128xf32> to vector<8x128xf32>
    %cst_19 = arith.constant dense<0.000000e+00> : vector<8x128xf32>
    %116 = tpu.matmul %114, %11, %cst_19 {dimension_numbers = #tpu.dot_dimension_numbers<[1], [0], [0], [1], [0, 0, 1, 1], [], []>} : vector<8x32xf32>, vector<32x128xf32>, vector<8x128xf32> -> vector<8x128xf32>
    %117 = arith.addf %115, %116 : vector<8x128xf32>
    %118 = math.tanh %117 : vector<8x128xf32>
    %119 = arith.negf %117 : vector<8x128xf32>
    %120 = math.exp %119 : vector<8x128xf32>
    %cst_20 = arith.constant 1.000000e+00 : f32
    %121 = vector.broadcast %cst_20 : f32 to vector<8x128xf32>
    %122 = arith.addf %121, %120 : vector<8x128xf32>
    %123 = arith.divf %121, %122 : vector<8x128xf32>
    %124 = arith.select %17, %118, %123 : vector<8x128xi1>, vector<8x128xf32>
    %125 = vector.extract_strided_slice %124 {offsets = [0, 0], sizes = [8, 32], strides = [1, 1]} : vector<8x128xf32> to vector<8x32xf32>
    %126 = vector.extract_strided_slice %124 {offsets = [0, 32], sizes = [8, 32], strides = [1, 1]} : vector<8x128xf32> to vector<8x32xf32>
    %127 = vector.extract_strided_slice %124 {offsets = [0, 64], sizes = [8, 32], strides = [1, 1]} : vector<8x128xf32> to vector<8x32xf32>
    %128 = vector.extract_strided_slice %124 {offsets = [0, 96], sizes = [8, 32], strides = [1, 1]} : vector<8x128xf32> to vector<8x32xf32>
    %129 = arith.mulf %126, %112 : vector<8x32xf32>
    %130 = arith.mulf %125, %127 : vector<8x32xf32>
    %131 = arith.addf %129, %130 : vector<8x32xf32>
    %132 = math.tanh %131 : vector<8x32xf32>
    %133 = arith.mulf %128, %132 : vector<8x32xf32>
    %134 = vector.extract_strided_slice %10 {offsets = [48, 0], sizes = [8, 128], strides = [1, 1]} : vector<64x128xf32> to vector<8x128xf32>
    %cst_21 = arith.constant dense<0.000000e+00> : vector<8x128xf32>
    %135 = tpu.matmul %133, %11, %cst_21 {dimension_numbers = #tpu.dot_dimension_numbers<[1], [0], [0], [1], [0, 0, 1, 1], [], []>} : vector<8x32xf32>, vector<32x128xf32>, vector<8x128xf32> -> vector<8x128xf32>
    %136 = arith.addf %134, %135 : vector<8x128xf32>
    %137 = math.tanh %136 : vector<8x128xf32>
    %138 = arith.negf %136 : vector<8x128xf32>
    %139 = math.exp %138 : vector<8x128xf32>
    %cst_22 = arith.constant 1.000000e+00 : f32
    %140 = vector.broadcast %cst_22 : f32 to vector<8x128xf32>
    %141 = arith.addf %140, %139 : vector<8x128xf32>
    %142 = arith.divf %140, %141 : vector<8x128xf32>
    %143 = arith.select %17, %137, %142 : vector<8x128xi1>, vector<8x128xf32>
    %144 = vector.extract_strided_slice %143 {offsets = [0, 0], sizes = [8, 32], strides = [1, 1]} : vector<8x128xf32> to vector<8x32xf32>
    %145 = vector.extract_strided_slice %143 {offsets = [0, 32], sizes = [8, 32], strides = [1, 1]} : vector<8x128xf32> to vector<8x32xf32>
    %146 = vector.extract_strided_slice %143 {offsets = [0, 64], sizes = [8, 32], strides = [1, 1]} : vector<8x128xf32> to vector<8x32xf32>
    %147 = vector.extract_strided_slice %143 {offsets = [0, 96], sizes = [8, 32], strides = [1, 1]} : vector<8x128xf32> to vector<8x32xf32>
    %148 = arith.mulf %145, %131 : vector<8x32xf32>
    %149 = arith.mulf %144, %146 : vector<8x32xf32>
    %150 = arith.addf %148, %149 : vector<8x32xf32>
    %151 = math.tanh %150 : vector<8x32xf32>
    %152 = arith.mulf %147, %151 : vector<8x32xf32>
    %153 = vector.extract_strided_slice %10 {offsets = [56, 0], sizes = [8, 128], strides = [1, 1]} : vector<64x128xf32> to vector<8x128xf32>
    %cst_23 = arith.constant dense<0.000000e+00> : vector<8x128xf32>
    %154 = tpu.matmul %152, %11, %cst_23 {dimension_numbers = #tpu.dot_dimension_numbers<[1], [0], [0], [1], [0, 0, 1, 1], [], []>} : vector<8x32xf32>, vector<32x128xf32>, vector<8x128xf32> -> vector<8x128xf32>
    %155 = arith.addf %153, %154 : vector<8x128xf32>
    %156 = math.tanh %155 : vector<8x128xf32>
    %157 = arith.negf %155 : vector<8x128xf32>
    %158 = math.exp %157 : vector<8x128xf32>
    %cst_24 = arith.constant 1.000000e+00 : f32
    %159 = vector.broadcast %cst_24 : f32 to vector<8x128xf32>
    %160 = arith.addf %159, %158 : vector<8x128xf32>
    %161 = arith.divf %159, %160 : vector<8x128xf32>
    %162 = arith.select %17, %156, %161 : vector<8x128xi1>, vector<8x128xf32>
    %163 = vector.extract_strided_slice %162 {offsets = [0, 0], sizes = [8, 32], strides = [1, 1]} : vector<8x128xf32> to vector<8x32xf32>
    %164 = vector.extract_strided_slice %162 {offsets = [0, 32], sizes = [8, 32], strides = [1, 1]} : vector<8x128xf32> to vector<8x32xf32>
    %165 = vector.extract_strided_slice %162 {offsets = [0, 64], sizes = [8, 32], strides = [1, 1]} : vector<8x128xf32> to vector<8x32xf32>
    %166 = vector.extract_strided_slice %162 {offsets = [0, 96], sizes = [8, 32], strides = [1, 1]} : vector<8x128xf32> to vector<8x32xf32>
    %167 = arith.mulf %164, %150 : vector<8x32xf32>
    %168 = arith.mulf %163, %165 : vector<8x32xf32>
    %169 = arith.addf %167, %168 : vector<8x32xf32>
    %170 = math.tanh %169 : vector<8x32xf32>
    %171 = arith.mulf %166, %170 : vector<8x32xf32>
    %172 = tpu.concatenate %38, %57, %76, %95, %114, %133, %152, %171 in 1 : vector<8x32xf32>, vector<8x32xf32>, vector<8x32xf32>, vector<8x32xf32>, vector<8x32xf32>, vector<8x32xf32>, vector<8x32xf32>, vector<8x32xf32> -> vector<8x256xf32>
    %c0_25 = arith.constant 0 : index
    %c0_26 = arith.constant 0 : index
    %173 = vector.load %arg5[%c0_25, %c0_26] : memref<256x48xf32, #tpu.memory_space<vmem>>, vector<256x48xf32>
    %cst_27 = arith.constant dense<0.000000e+00> : vector<8x48xf32>
    %174 = tpu.matmul %172, %173, %cst_27 {dimension_numbers = #tpu.dot_dimension_numbers<[1], [0], [0], [1], [0, 0, 1, 1], [], []>} : vector<8x256xf32>, vector<256x48xf32>, vector<8x48xf32> -> vector<8x48xf32>
    %c0_28 = arith.constant 0 : index
    %c0_29 = arith.constant 0 : index
    %175 = vector.load %arg6[%c0_28, %c0_29] : memref<1x48xf32, #tpu.memory_space<vmem>>, vector<1x48xf32>
    %176 = vector.broadcast %175 : vector<1x48xf32> to vector<8x48xf32>
    %177 = arith.addf %174, %176 : vector<8x48xf32>
    %178 = math.tanh %177 : vector<8x48xf32>
    %179 = vector.extract_strided_slice %178 {offsets = [0, 0], sizes = [8, 8], strides = [1, 1]} : vector<8x48xf32> to vector<8x8xf32>
    %180 = vector.extract_strided_slice %178 {offsets = [0, 8], sizes = [8, 8], strides = [1, 1]} : vector<8x48xf32> to vector<8x8xf32>
    %181 = arith.maximumf %179, %180 : vector<8x8xf32>
    %182 = vector.extract_strided_slice %178 {offsets = [0, 16], sizes = [8, 8], strides = [1, 1]} : vector<8x48xf32> to vector<8x8xf32>
    %183 = arith.maximumf %181, %182 : vector<8x8xf32>
    %184 = vector.extract_strided_slice %178 {offsets = [0, 24], sizes = [8, 8], strides = [1, 1]} : vector<8x48xf32> to vector<8x8xf32>
    %185 = arith.maximumf %183, %184 : vector<8x8xf32>
    %186 = vector.extract_strided_slice %178 {offsets = [0, 32], sizes = [8, 8], strides = [1, 1]} : vector<8x48xf32> to vector<8x8xf32>
    %187 = arith.maximumf %185, %186 : vector<8x8xf32>
    %188 = vector.extract_strided_slice %178 {offsets = [0, 40], sizes = [8, 8], strides = [1, 1]} : vector<8x48xf32> to vector<8x8xf32>
    %189 = arith.maximumf %187, %188 : vector<8x8xf32>
    %c0_30 = arith.constant 0 : index
    %c0_31 = arith.constant 0 : index
    %190 = vector.load %arg7[%c0_30, %c0_31] : memref<8x8xf32, #tpu.memory_space<vmem>>, vector<8x8xf32>
    tpu.vector_store %arg7[%c0_30, %c0_31], %189 {strides = array<i32>} : memref<8x8xf32, #tpu.memory_space<vmem>>, vector<8x8xf32>,
    return
  }
  func.func @transform_0(%arg0: i32) -> (i32, i32) {
    %c0_i32 = arith.constant 0 : i32
    %c0_i32_0 = arith.constant 0 : i32
    %c0_i32_1 = arith.constant 0 : i32
    return %c0_i32, %c0_i32_0 : i32, i32
  }
  func.func @transform_1(%arg0: i32) -> (i32, i32) {
    %c0_i32 = arith.constant 0 : i32
    %c0_i32_0 = arith.constant 0 : i32
    %c0_i32_1 = arith.constant 0 : i32
    return %c0_i32, %c0_i32_0 : i32, i32
  }
  func.func @transform_2(%arg0: i32) -> (i32, i32) {
    %c0_i32 = arith.constant 0 : i32
    %c0_i32_0 = arith.constant 0 : i32
    %c0_i32_1 = arith.constant 0 : i32
    return %c0_i32, %c0_i32_0 : i32, i32
  }
  func.func @transform_3(%arg0: i32) -> (i32, i32) {
    %c0_i32 = arith.constant 0 : i32
    %c0_i32_0 = arith.constant 0 : i32
    %c0_i32_1 = arith.constant 0 : i32
    return %c0_i32, %c0_i32_0 : i32, i32
  }
  func.func @transform_4(%arg0: i32) -> (i32, i32) {
    %c0_i32 = arith.constant 0 : i32
    %c0_i32_0 = arith.constant 0 : i32
    %c0_i32_1 = arith.constant 0 : i32
    return %c0_i32, %c0_i32_0 : i32, i32
  }
  func.func @transform_5(%arg0: i32) -> (i32, i32) {
    %c0_i32 = arith.constant 0 : i32
    %c0_i32_0 = arith.constant 0 : i32
    %c0_i32_1 = arith.constant 0 : i32
    return %c0_i32, %c0_i32_0 : i32, i32
  }
  func.func @transform_6(%arg0: i32) -> (i32, i32) {
    %c0_i32 = arith.constant 0 : i32
    %c0_i32_0 = arith.constant 0 : i32
    %c0_i32_1 = arith.constant 0 : i32
    return %c0_i32, %c0_i32_0 : i32, i32
  }
}

</mosaic_0001>

<bundles_post_ra>
// kernel: my_rnn_cnn_forward.1
= control target key start
LH: loop header
LB: loop body
LE: loop exit
PB: predicated region body
PF: predicated region fallthrough
CT: control target
= control target key end

     0   :  { %v1621_v0 = vmov 0   ;;  %v1622_v15 = vmov 0.0|0.0   ;;  %vm120_vm0 = vcmask 1041408   ;;  %vm1623_vm1 = vmmov 0   ;;  %s1626_s10 = smov 32   ;;  %s1627_s21 = smov 96   ;;  %s2025_s0 = inlined_call_operand.vmem [shape: s32[64,1], index: 0, kind: input, shape index: {}]   ;;  %s2026_s1 = inlined_call_operand.vmem [shape: f32[50,128], index: 1, kind: input, shape index: {}]   ;;  %s2027_s2 = inlined_call_operand.vmem [shape: f32[32,128], index: 2, kind: input, shape index: {}]   ;;  %s2028_s3 = inlined_call_operand.vmem [shape: f32[1,128], index: 3, kind: input, shape index: {}]   ;;  %s2029_s4 = inlined_call_operand.vmem [shape: f32[256,48], index: 4, kind: input, shape index: {}]   ;;  %s2030_s5 = inlined_call_operand.vmem [shape: f32[1,48], index: 5, kind: input, shape index: {}]   ;;  %s2031_s6 = inlined_call_operand.vmem [shape: f32[8,8], index: 6, kind: output, shape index: {}]  }
   0x1   :  { %1544 = vset.pattern.permute.xlu1 %v1621_v0  ;;  %1543 = vset.pattern.permute.xlu0 %v1621_v0  ;;  %v25_v1 = vld [vmem:[%s2025_s0 + $0x10] sm:$0xff]  ;;  %v23_v2 = vld [vmem:[%s2025_s0] sm:$0xff]  ;;  %v26_v3 = vld [vmem:[%s2025_s0 + $0x18] sm:$0xff]  ;;  %v1624_v26 = vmov 0.0   ;;  %v31_v27 = vlaneseq  ;;  %vm95_vm2 = vcmask 408576   ;;  %vm236_vm14 = vcmask 261120  }
   0x2   :  { %40 = vperm.xlu1 %1544, %v25_v1   ;;  %34 = vperm.xlu0 %1543, %v23_v2   ;;  %v24_v4 = vld [vmem:[%s2025_s0 + $0x8] sm:$0xff]  ;;  %v81_v5 = vld [vmem:[%s2026_s1] sm:$0xff]  ;;  %v83_v7 = vld [vmem:[%s2026_s1 + $0x10] sm:$0xff]  ;;  %vm1058_vm15 = vcmask 523264   ;;  %s1628_s22 = smov 112   ;;  %s1629_s23 = smov 120  }
   0x3   :  { %v82_v6 = vld [vmem:[%s2026_s1 + $0x8] sm:$0xff]  ;;  %v84_v8 = vld [vmem:[%s2026_s1 + $0x18] sm:$0xff]  ;;  %v85_v11 = vld [vmem:[%s2026_s1 + $0x20] sm:$0xff]  ;;  %1464 = vmatprep.subr.bf16.mxu1 %v1622_v15  ;;  %1382 = vmatprep.mubr.msk.f32.mxu1 %vm1623_vm1, %v1624_v26  ;;  %v1736_v28 = vand.u32 127, %v31_v27  ;;  %s1630_s24 = smov 104   ;;  %s1631_s25 = smov 88  }
   0x4   :  { %v1440_v9 = vpack.c.bf16 %v82_v6, %v81_v5  ;;  %v1444_v10 = vpack.c.bf16 %v84_v8, %v83_v7  ;;  %v86_v12 = vld [vmem:[%s2026_s1 + $0x28] sm:$0xff]  ;;  %v27_v14 = vld [vmem:[%s2025_s0 + $0x20] sm:$0xff]  ;;  %v30_v20 = vld [vmem:[%s2025_s0 + $0x38] sm:$0xff] }
   0x5   :  { %v28_v13 = vld [vmem:[%s2025_s0 + $0x28] sm:$0xff]  ;;  %v1448_v16 = vpack.c.bf16 %v86_v12, %v85_v11  ;;  %v229_v17 = vld [vmem:[%s2027_s2] sm:$0xff]  ;;  %v29_v21 = vld [vmem:[%s2025_s0 + $0x30] sm:$0xff]  ;;  %vm233_vm11 = vcmp.ge.s32.totalorder %v1736_v28, 64  ;;  %vm234_vm12 = vcmp.lt.s32.totalorder %v1736_v28, 96 }
   0x6   :  { %43 = vperm.xlu1 %1544, %v26_v3   ;;  %37 = vperm.xlu0 %1543, %v24_v4   ;;  %v230_v18 = vld [vmem:[%s2027_s2 + $0x8] sm:$0xff]  ;;  %v87_v22 = vld [vmem:[%s2026_s1 + $0x30] sm:$0x3]  ;;  %v232_v24 = vld [vmem:[%s2027_s2 + $0x18] sm:$0xff] }
   0x7   :  { %1441 = vmatprep.subr.bf16.mxu0 %v1440_v9  ;;  %v1710_v19 = vpack.c.bf16 %v230_v18, %v229_v17  ;;  %v231_v23 = vld [vmem:[%s2027_s2 + $0x10] sm:$0xff]  ;;  %v1210_v45 = vld [vmem:[%s2028_s3] ss:$0 sm:$0xff]  ;;  %vm1792_vm13 = vmand %vm233_vm11, %vm234_vm12  ;;  %s1625_s3 = smov 64  }
   0x8   :  { %1443 = vmatpush3.bf16.msra.mxu0 %v1440_v9  ;;  %v1729_v25 = vpack.c.bf16 %v232_v24, %v231_v23  ;;  %v1082_v4 = vld [vmem:[%s2029_s4 + $0x88] sm:$0xff] }
   0x9   :  { %1445 = vmatprep.subr.bf16.mxu0 %v1444_v10  ;;  %1466 = vmatpush3.bf16.msra.mxu1 %v1710_v19 }
   0xa   :  { %49 = vperm.xlu1 %1544, %v28_v13   ;;  %46 = vperm.xlu0 %1543, %v27_v14  }
   0xb   :  { %1467 = vmatprep.subr.bf16.mxu1 %v1622_v15 }
   0xc   :  { %1447 = vmatpush3.bf16.msra.mxu0 %v1444_v10 }
   0xd   :  { %1449 = vmatprep.subr.bf16.mxu0 %v1448_v16  ;;  %1469 = vmatpush3.bf16.msra.mxu1 %v1729_v25 }
   0xe   :  { %55 = vperm.xlu1 %1544, %v30_v20   ;;  %52 = vperm.xlu0 %1543, %v29_v21  }
   0xf   :  { %1476 = vmatprep.subr.bf16.mxu1 %v1622_v15 }
  0x10   :  { %1451 = vmatpush3.bf16.msra.mxu0 %v1448_v16 }
  0x11   :  { %1338 = vmatprep.subr.msk.mxu0 %vm120_vm0, %v87_v22 }
  0x14   :  { %1339 = vmatpush3.msk.msra.mxu0 %vm120_vm0, %v87_v22  ;;  %vm1060_vm0 = vcmask 785408  }
  0x15   :  { %1452 = vmatprep.subr.bf16.mxu0 %v1622_v15 }
  0x81   :  { %v41_v29 = vpop.permute.xlu1 %40  ;;  %v35_v30 = vpop.permute.xlu0 %34 }
  0x82   :  { %vm57_vm3 = vcmp.eq.s32.totalorder %v1736_v28, %v35_v30  ;;  %vm59_vm4 = vcmp.eq.s32.totalorder %v1736_v28, %v41_v29 }
  0x83   :  { %v1202_v31 = vsel %vm57_vm3, 1.0, %v1624_v26  ;;  %v1204_v34 = vsel %vm59_vm4, 1.0, %v1624_v26 }
  0x84   :  { %1340 = vmatprep.mubr.msk.f32.mxu0 %vm95_vm2, %v1202_v31 }
  0x85   :  { %v44_v32 = vpop.permute.xlu1 %43  ;;  %v38_v33 = vpop.permute.xlu0 %37 }
  0x86   :  { %vm58_vm5 = vcmp.eq.s32.totalorder %v1736_v28, %v38_v33  ;;  %vm60_vm6 = vcmp.eq.s32.totalorder %v1736_v28, %v44_v32 }
  0x87   :  { %v1203_v35 = vsel %vm58_vm5, 1.0, %v1624_v26  ;;  %v1205_v38 = vsel %vm60_vm6, 1.0, %v1624_v26 }
  0x88   :  { %1341 = vmatmul.mubr.msk.f32.vlgmr.msra.gmra.mrb[0].mxu0 %vm95_vm2, %v1203_v35 }
  0x89   :  { %1454 = vmatpush3.bf16.msra.mxu0 %v1710_v19  ;;  %v50_v36 = vpop.permute.xlu1 %49  ;;  %1343 = vmatprep.mubr.msk.f32.mxu0 %vm95_vm2, %v1204_v34  ;;  %v47_v37 = vpop.permute.xlu0 %46 }
  0x8a   :  { %vm61_vm7 = vcmp.eq.s32.totalorder %v1736_v28, %v47_v37  ;;  %1455 = vmatprep.subr.bf16.mxu0 %v1622_v15  ;;  %vm62_vm8 = vcmp.eq.s32.totalorder %v1736_v28, %v50_v36 }
  0x8b   :  { %v1206_v39 = vsel %vm61_vm7, 1.0, %v1624_v26  ;;  %v1207_v42 = vsel %vm62_vm8, 1.0, %v1624_v26 }
  0x8c   :  { %1344 = vmatmul.mubr.msk.f32.gmra.mrb[2].mxu0 %vm95_vm2, %v1205_v38 }
  0x8d   :  { %v56_v40 = vpop.permute.xlu1 %55  ;;  %1346 = vmatprep.mubr.msk.f32.mxu0 %vm95_vm2, %v1206_v39  ;;  %v53_v41 = vpop.permute.xlu0 %52  ;;  %1457 = vmatpush3.bf16.msra.mxu0 %v1729_v25 }
  0x8e   :  { %vm63_vm9 = vcmp.eq.s32.totalorder %v1736_v28, %v53_v41  ;;  %1458 = vmatprep.subr.bf16.mxu0 %v1622_v15  ;;  %vm64_vm10 = vcmp.eq.s32.totalorder %v1736_v28, %v56_v40 }
  0x8f   :  { %v1208_v43 = vsel %vm63_vm9, 1.0, %v1624_v26  ;;  %v1209_v44 = vsel %vm64_vm10, 1.0, %v1624_v26 }
  0x90   :  { %1347 = vmatmul.mubr.msk.f32.gmra.mrb[4].mxu0 %vm95_vm2, %v1207_v42 }
  0x91   :  { %1349 = vmatprep.mubr.msk.f32.mxu0 %vm95_vm2, %v1208_v43 }
  0x94   :  { %1350 = vmatmul.mubr.msk.f32.gmra.mrb[6].mxu0 %vm95_vm2, %v1209_v44 }
  0x95   :  { %1360 = vmatprep.mubr.msk.f32.mxu0 %vm1623_vm1, %v1624_v26 }
  0x98   :  { %1361 = vmatmul.mubr.f32.vlgmr.msra.gmra.mrb[8].mxu0 %v1624_v26 }
  0x99   :  { %1460 = vmatpush3.bf16.msra.mxu0 %v1710_v19  ;;  %1371 = vmatprep.mubr.msk.f32.mxu0 %vm1623_vm1, %v1624_v26 }
  0x9a   :  { %1461 = vmatprep.subr.bf16.mxu0 %v1622_v15 }
  0x9d   :  { %1463 = vmatpush3.bf16.msra.mxu0 %v1729_v25 }
  0x9e   :  { %1470 = vmatprep.subr.bf16.mxu0 %v1622_v15 }
 0x15b   :  { %v1342_v46 = vpop.f32.mrb[0].mxu0 }
 0x15c   :  { %v196_v47 = vadd.f32 %v1342_v46, %v1210_v45  ;;  %v190_v48 = vpop.f32.mrb[1].mxu0 }
 0x15d   :  { %v191_v61 = vadd.f32 %v1210_v45, %v190_v48 }
 0x15f   :  { %v1345_v49 = vpop.f32.mrb[2].mxu0 }
 0x160   :  { %v1778_v50 = vadd.f32 %v1345_v49, %v1210_v45  ;;  %v200_v51 = vpop.f32.mrb[3].mxu0 }
 0x161   :  { %v1780_v52 = vadd.f32 %v1210_v45, %v200_v51 }
 0x163   :  { %v1348_v53 = vpop.f32.mrb[4].mxu0 }
 0x164   :  { %v1782_v54 = vadd.f32 %v1348_v53, %v1210_v45  ;;  %v210_v55 = vpop.f32.mrb[5].mxu0 }
 0x165   :  { %v1784_v56 = vadd.f32 %v1210_v45, %v210_v55 }
 0x167   :  { %v1351_v57 = vpop.f32.mrb[6].mxu0 }
 0x168   :  { %v1786_v58 = vadd.f32 %v1351_v57, %v1210_v45  ;;  %v220_v59 = vpop.f32.mrb[7].mxu0 }
 0x169   :  { %v1788_v60 = vadd.f32 %v1210_v45, %v220_v59 }
 0x16b   :  { %v306_v62 = vpop.f32.mrb[8].mxu0 }
 0x16c   :  { %v310_v63 = vadd.f32 %v306_v62, %v191_v61  ;;  %v1362_v0 = vpop.f32.mrb[9].mxu0 }
 0x16e   :  { %v1220_v1 = vmul.f32 -1.442695, %v310_v63 }
 0x170   :  { %1555 = vpow2.f32 %v1220_v1 }
 0x171   :  { %1557 = vtanh.f32 %v310_v63 }
 0x17a   :  { %v1556_v2 = vpop.eup %1555 }
 0x17b   :  { %v315_v3 = vadd.f32 1.0, %v1556_v2  ;;  %v1558_v5 = vpop.eup %1557 }
 0x17d   :  { %1559 = vrcp.f32 %v315_v3 }
 0x187   :  { %v1560_v6 = vpop.eup %1559 }
 0x188   :  { %v318_v7 = vsel %vm1792_vm13, %v1558_v5, %v1560_v6 }
 0x189   :  { %321 = vrot.lane.b32.xlu0 %v318_v7, %s1625_s3  ;;  %v319_v10 = vmul.f32 0.0, %v318_v7 }
 0x1fb   :  { %v322_v8 = vpop.permute.xlu0 %321 }
 0x1fc   :  { %v324_v9 = vmul.f32 %v322_v8, %v318_v7 }
 0x1fe   :  { %326 = vrot.lane.b32.xlu1 %v324_v9, %s1626_s10 }
 0x270   :  { %v327_v11 = vpop.permute.xlu1 %326 }
 0x271   :  { %v329_v12 = vadd.f32 %v327_v11, %v319_v10 }
 0x273   :  { %1561 = vtanh.f32 %v329_v12 }
 0x27d   :  { %v1562_v13 = vpop.eup %1561 }
 0x27e   :  { %332 = vrot.lane.b32.xlu0 %v1562_v13, %s1625_s3 }
 0x2f0   :  { %v333_v14 = vpop.permute.xlu0 %332 }
 0x2f1   :  { %v335_v16 = vmul.f32 %v333_v14, %v318_v7 }
 0x2f3   :  { %337 = vrot.lane.b32.xlu1 %v335_v16, %s1626_s10 }
 0x365   :  { %v1802_v17 = vpop.permute.xlu1 %337 }
 0x366   :  { %1372 = vmatmul.mubr.msk.f32.vlgmr.msra.gmra.mrb[10].mxu0 %vm236_vm14, %v1802_v17 }
 0x367   :  { %1472 = vmatpush3.bf16.msra.mxu0 %v1710_v19  ;;  %1393 = vmatprep.mubr.msk.f32.mxu0 %vm1623_vm1, %v1624_v26 }
 0x368   :  { %1473 = vmatprep.subr.bf16.mxu0 %v1622_v15 }
 0x36b   :  { %1475 = vmatpush3.bf16.msra.mxu0 %v1729_v25 }
 0x36c   :  { %1482 = vmatprep.subr.bf16.mxu0 %v1622_v15 }
 0x439   :  { %v407_v18 = vpop.f32.mrb[10].mxu0 }
 0x43a   :  { %v411_v20 = vadd.f32 %v407_v18, %v196_v47  ;;  %v1373_v21 = vpop.f32.mrb[11].mxu0 }
 0x43c   :  { %v1222_v22 = vmul.f32 -1.442695, %v411_v20 }
 0x43e   :  { %1563 = vpow2.f32 %v1222_v22 }
 0x43f   :  { %1565 = vtanh.f32 %v411_v20 }
 0x448   :  { %v1564_v23 = vpop.eup %1563 }
 0x449   :  { %v416_v24 = vadd.f32 1.0, %v1564_v23  ;;  %v1566_v27 = vpop.eup %1565 }
 0x44b   :  { %1567 = vrcp.f32 %v416_v24 }
 0x455   :  { %v1568_v28 = vpop.eup %1567 }
 0x456   :  { %v419_v29 = vsel %vm1792_vm13, %v1566_v27, %v1568_v28 }
 0x457   :  { %422 = vrot.lane.b32.xlu0 %v419_v29, %s1625_s3  ;;  %v420_v32 = vmul.f32 %v419_v29, %v329_v12 }
 0x4c9   :  { %v423_v30 = vpop.permute.xlu0 %422 }
 0x4ca   :  { %v425_v31 = vmul.f32 %v423_v30, %v419_v29 }
 0x4cc   :  { %427 = vrot.lane.b32.xlu1 %v425_v31, %s1626_s10 }
 0x53e   :  { %v428_v33 = vpop.permute.xlu1 %427 }
 0x53f   :  { %v430_v34 = vadd.f32 %v428_v33, %v420_v32 }
 0x541   :  { %1569 = vtanh.f32 %v430_v34 }
 0x54b   :  { %v1570_v35 = vpop.eup %1569 }
 0x54c   :  { %433 = vrot.lane.b32.xlu0 %v1570_v35, %s1625_s3 }
 0x5be   :  { %v434_v36 = vpop.permute.xlu0 %433 }
 0x5bf   :  { %v1817_v37 = vmul.f32 %v434_v36, %v419_v29 }
 0x5c1   :  { %438 = vrot.lane.b32.xlu1 %v1817_v37, %s1626_s10 }
 0x633   :  { %v439_v38 = vpop.permute.xlu1 %438 }
 0x634   :  { %1383 = vmatmul.mubr.msk.f32.vlgmr.msra.gmra.mrb[0].mxu1 %vm236_vm14, %v439_v38 }
 0x635   :  { %1478 = vmatpush3.bf16.msra.mxu1 %v1710_v19  ;;  %1404 = vmatprep.mubr.msk.f32.mxu1 %vm1623_vm1, %v1624_v26 }
 0x636   :  { %1479 = vmatprep.subr.bf16.mxu1 %v1622_v15 }
 0x639   :  { %1481 = vmatpush3.bf16.msra.mxu1 %v1729_v25 }
 0x63a   :  { %1488 = vmatprep.subr.bf16.mxu1 %v1622_v15 }
 0x707   :  { %v508_v39 = vpop.f32.mrb[0].mxu1 }
 0x708   :  { %v512_v40 = vadd.f32 %v508_v39, %v1780_v52  ;;  %v1384_v41 = vpop.f32.mrb[1].mxu1 }
 0x70a   :  { %v1224_v42 = vmul.f32 -1.442695, %v512_v40 }
 0x70c   :  { %1571 = vpow2.f32 %v1224_v42 }
 0x70d   :  { %1573 = vtanh.f32 %v512_v40 }
 0x716   :  { %v1572_v43 = vpop.eup %1571 }
 0x717   :  { %v517_v44 = vadd.f32 1.0, %v1572_v43  ;;  %v1574_v45 = vpop.eup %1573 }
 0x719   :  { %1575 = vrcp.f32 %v517_v44 }
 0x723   :  { %v1576_v46 = vpop.eup %1575 }
 0x724   :  { %v520_v47 = vsel %vm1792_vm13, %v1574_v45, %v1576_v46 }
 0x725   :  { %523 = vrot.lane.b32.xlu0 %v520_v47, %s1625_s3  ;;  %v521_v51 = vmul.f32 %v520_v47, %v430_v34 }
 0x797   :  { %v524_v48 = vpop.permute.xlu0 %523 }
 0x798   :  { %v526_v49 = vmul.f32 %v524_v48, %v520_v47 }
 0x79a   :  { %528 = vrot.lane.b32.xlu1 %v526_v49, %s1626_s10 }
 0x80c   :  { %v529_v52 = vpop.permute.xlu1 %528 }
 0x80d   :  { %v531_v53 = vadd.f32 %v529_v52, %v521_v51 }
 0x80f   :  { %1577 = vtanh.f32 %v531_v53 }
 0x819   :  { %v1578_v55 = vpop.eup %1577 }
 0x81a   :  { %534 = vrot.lane.b32.xlu0 %v1578_v55, %s1625_s3 }
 0x88c   :  { %v535_v57 = vpop.permute.xlu0 %534 }
 0x88d   :  { %v1834_v59 = vmul.f32 %v535_v57, %v520_v47 }
 0x88f   :  { %539 = vrot.lane.b32.xlu1 %v1834_v59, %s1626_s10 }
 0x901   :  { %v540_v61 = vpop.permute.xlu1 %539 }
 0x902   :  { %1394 = vmatmul.mubr.msk.f32.vlgmr.msra.gmra.mrb[12].mxu0 %vm236_vm14, %v540_v61 }
 0x903   :  { %1484 = vmatpush3.bf16.msra.mxu0 %v1710_v19  ;;  %1415 = vmatprep.mubr.msk.f32.mxu0 %vm1623_vm1, %v1624_v26 }
 0x904   :  { %1485 = vmatprep.subr.bf16.mxu0 %v1622_v15 }
 0x907   :  { %1487 = vmatpush3.bf16.msra.mxu0 %v1729_v25 }
 0x908   :  { %1494 = vmatprep.subr.bf16.mxu0 %v1622_v15 }
 0x9d5   :  { %v609_v62 = vpop.f32.mrb[12].mxu0 }
 0x9d6   :  { %v613_v63 = vadd.f32 %v609_v62, %v1778_v50  ;;  %v1395_v0 = vpop.f32.mrb[13].mxu0 }
 0x9d8   :  { %v1226_v1 = vmul.f32 -1.442695, %v613_v63 }
 0x9da   :  { %1579 = vpow2.f32 %v1226_v1 }
 0x9db   :  { %1581 = vtanh.f32 %v613_v63 }
 0x9e4   :  { %v1580_v2 = vpop.eup %1579 }
 0x9e5   :  { %v618_v3 = vadd.f32 1.0, %v1580_v2  ;;  %v1582_v5 = vpop.eup %1581 }
 0x9e7   :  { %1583 = vrcp.f32 %v618_v3 }
 0x9f1   :  { %v1584_v6 = vpop.eup %1583 }
 0x9f2   :  { %v621_v7 = vsel %vm1792_vm13, %v1582_v5, %v1584_v6 }
 0x9f3   :  { %624 = vrot.lane.b32.xlu0 %v621_v7, %s1625_s3  ;;  %v622_v10 = vmul.f32 %v621_v7, %v531_v53 }
 0xa65   :  { %v625_v8 = vpop.permute.xlu0 %624 }
 0xa66   :  { %v627_v9 = vmul.f32 %v625_v8, %v621_v7 }
 0xa68   :  { %629 = vrot.lane.b32.xlu1 %v627_v9, %s1626_s10 }
 0xada   :  { %v630_v50 = vpop.permute.xlu1 %629 }
 0xadb   :  { %v632_v11 = vadd.f32 %v630_v50, %v622_v10 }
 0xadd   :  { %1585 = vtanh.f32 %v632_v11 }
 0xae7   :  { %v1586_v12 = vpop.eup %1585 }
 0xae8   :  { %635 = vrot.lane.b32.xlu0 %v1586_v12, %s1625_s3 }
 0xb5a   :  { %v636_v13 = vpop.permute.xlu0 %635 }
 0xb5b   :  { %v1851_v14 = vmul.f32 %v636_v13, %v621_v7 }
 0xb5d   :  { %640 = vrot.lane.b32.xlu1 %v1851_v14, %s1626_s10 }
 0xbcf   :  { %v641_v16 = vpop.permute.xlu1 %640 }
 0xbd0   :  { %1405 = vmatmul.mubr.msk.f32.vlgmr.msra.gmra.mrb[2].mxu1 %vm236_vm14, %v641_v16 }
 0xbd1   :  { %1490 = vmatpush3.bf16.msra.mxu1 %v1710_v19  ;;  %1426 = vmatprep.mubr.msk.f32.mxu1 %vm1623_vm1, %v1624_v26 }
 0xbd2   :  { %1491 = vmatprep.subr.bf16.mxu1 %v1622_v15 }
 0xbd5   :  { %1493 = vmatpush3.bf16.msra.mxu1 %v1729_v25 }
 0xca3   :  { %v710_v18 = vpop.f32.mrb[2].mxu1 }
 0xca4   :  { %v714_v20 = vadd.f32 %v710_v18, %v1784_v56  ;;  %v1406_v21 = vpop.f32.mrb[3].mxu1 }
 0xca6   :  { %v1228_v22 = vmul.f32 -1.442695, %v714_v20 }
 0xca8   :  { %1587 = vpow2.f32 %v1228_v22 }
 0xca9   :  { %1589 = vtanh.f32 %v714_v20 }
 0xcb2   :  { %v1588_v23 = vpop.eup %1587 }
 0xcb3   :  { %v719_v24 = vadd.f32 1.0, %v1588_v23  ;;  %v1590_v27 = vpop.eup %1589 }
 0xcb5   :  { %1591 = vrcp.f32 %v719_v24 }
 0xcbf   :  { %v1592_v28 = vpop.eup %1591 }
 0xcc0   :  { %v722_v29 = vsel %vm1792_vm13, %v1590_v27, %v1592_v28  ;;  %v1081_v28 = vld [vmem:[%s2029_s4 + $0x80] sm:$0xff] }
 0xcc1   :  { %725 = vrot.lane.b32.xlu0 %v722_v29, %s1625_s3  ;;  %v723_v32 = vmul.f32 %v722_v29, %v632_v11 }
 0xd33   :  { %v726_v30 = vpop.permute.xlu0 %725 }
 0xd34   :  { %v728_v31 = vmul.f32 %v726_v30, %v722_v29  ;;  %v1500_v30 = vpack.c.bf16 %v1082_v4, %v1081_v28 }
 0xd36   :  { %730 = vrot.lane.b32.xlu1 %v728_v31, %s1626_s10  ;;  %v1066_v31 = vld [vmem:[%s2029_s4 + $0x8] sm:$0xff]  ;;  %1501 = vmatprep.subr.bf16.mxu1 %v1500_v30 }
 0xda8   :  { %v731_v56 = vpop.permute.xlu1 %730 }
 0xda9   :  { %v733_v33 = vadd.f32 %v731_v56, %v723_v32  ;;  %v1084_v32 = vld [vmem:[%s2029_s4 + $0x98] sm:$0xff] }
 0xdab   :  { %1593 = vtanh.f32 %v733_v33 }
 0xdb5   :  { %v1594_v34 = vpop.eup %1593 }
 0xdb6   :  { %736 = vrot.lane.b32.xlu0 %v1594_v34, %s1625_s3  ;;  %v1067_v34 = vld [vmem:[%s2029_s4 + $0x10] sm:$0xff] }
 0xe28   :  { %v737_v35 = vpop.permute.xlu0 %736 }
 0xe29   :  { %v739_v36 = vmul.f32 %v737_v35, %v722_v29  ;;  %v1065_v29 = vld [vmem:[%s2029_s4] sm:$0xff]  ;;  %v1068_v35 = vld [vmem:[%s2029_s4 + $0x18] sm:$0xff] }
 0xe2a   :  { %v1502_v56 = vpack.c.bf16 %v1066_v31, %v1065_v29 }
 0xe2b   :  { %741 = vrot.lane.b32.xlu1 %v739_v36, %s1626_s10  ;;  %v1085_v36 = vld [vmem:[%s2029_s4 + $0xa0] sm:$0xff] }
 0xe9d   :  { %v1868_v38 = vpop.permute.xlu1 %741 }
 0xe9e   :  { %1416 = vmatmul.mubr.msk.f32.vlgmr.msra.gmra.mrb[14].mxu0 %vm236_vm14, %v1868_v38 }
 0xe9f   :  { %1496 = vmatpush3.bf16.msra.mxu0 %v1710_v19  ;;  %1437 = vmatprep.mubr.msk.f32.mxu0 %vm1623_vm1, %v1624_v26  ;;  %vm1196_vm1 = vcmask 64512  }
 0xea0   :  { %1497 = vmatprep.subr.bf16.mxu0 %v1622_v15 }
 0xea3   :  { %1499 = vmatpush3.bf16.msra.mxu0 %v1729_v25 }
 0xf71   :  { %v811_v39 = vpop.f32.mrb[14].mxu0 }
 0xf72   :  { %v815_v40 = vadd.f32 %v811_v39, %v1782_v54  ;;  %v1417_v41 = vpop.f32.mrb[15].mxu0  ;;  %v1086_v39 = vld [vmem:[%s2029_s4 + $0xa8] sm:$0xff] }
 0xf73   :  { %v1508_v41 = vpack.c.bf16 %v1086_v39, %v1085_v36 }
 0xf74   :  { %v1230_v42 = vmul.f32 -1.442695, %v815_v40 }
 0xf76   :  { %1595 = vpow2.f32 %v1230_v42  ;;  %v1069_v42 = vld [vmem:[%s2029_s4 + $0x20] sm:$0xff] }
 0xf77   :  { %1597 = vtanh.f32 %v815_v40  ;;  %v1506_v40 = vpack.c.bf16 %v1068_v35, %v1067_v34 }
 0xf80   :  { %v1596_v43 = vpop.eup %1595 }
 0xf81   :  { %v820_v44 = vadd.f32 1.0, %v1596_v43  ;;  %v1598_v45 = vpop.eup %1597  ;;  %v1070_v43 = vld [vmem:[%s2029_s4 + $0x28] sm:$0xff] }
 0xf83   :  { %1599 = vrcp.f32 %v820_v44  ;;  %v1087_v44 = vld [vmem:[%s2029_s4 + $0xb0] sm:$0xff] }
 0xf8d   :  { %v1600_v46 = vpop.eup %1599 }
 0xf8e   :  { %v823_v19 = vsel %vm1792_vm13, %v1598_v45, %v1600_v46  ;;  %v1088_v45 = vld [vmem:[%s2029_s4 + $0xb8] sm:$0xff]  ;;  %v1510_v46 = vpack.c.bf16 %v1070_v43, %v1069_v42 }
 0xf8f   :  { %826 = vrot.lane.b32.xlu0 %v823_v19, %s1625_s3  ;;  %v824_v25 = vmul.f32 %v823_v19, %v733_v33 }
0x1001   :  { %v827_v15 = vpop.permute.xlu0 %826 }
0x1002   :  { %v829_v26 = vmul.f32 %v827_v15, %v823_v19  ;;  %v1071_v15 = vld [vmem:[%s2029_s4 + $0x30] sm:$0xff] }
0x1004   :  { %831 = vrot.lane.b32.xlu1 %v829_v26, %s1626_s10  ;;  %v1072_v26 = vld [vmem:[%s2029_s4 + $0x38] sm:$0xff] }
0x1076   :  { %v832_v54 = vpop.permute.xlu1 %831 }
0x1077   :  { %v834_v47 = vadd.f32 %v832_v54, %v824_v25  ;;  %v1089_v25 = vld [vmem:[%s2029_s4 + $0xc0] sm:$0xff]  ;;  %v1090_v54 = vld [vmem:[%s2029_s4 + $0xc8] sm:$0xff] }
0x1079   :  { %1601 = vtanh.f32 %v834_v47 }
0x1083   :  { %v1602_v48 = vpop.eup %1601 }
0x1084   :  { %837 = vrot.lane.b32.xlu0 %v1602_v48, %s1625_s3  ;;  %v1516_v48 = vpack.c.bf16 %v1090_v54, %v1089_v25 }
0x10f6   :  { %v838_v49 = vpop.permute.xlu0 %837 }
0x10f7   :  { %v840_v51 = vmul.f32 %v838_v49, %v823_v19  ;;  %v1512_v19 = vpack.c.bf16 %v1088_v45, %v1087_v44  ;;  %v1073_v49 = vld [vmem:[%s2029_s4 + $0x40] sm:$0xff] }
0x10f9   :  { %842 = vrot.lane.b32.xlu1 %v840_v51, %s1626_s10 }
0x116b   :  { %v843_v52 = vpop.permute.xlu1 %842 }
0x116c   :  { %1427 = vmatmul.mubr.msk.f32.vlgmr.msra.gmra.mrb[4].mxu1 %vm236_vm14, %v843_v52  ;;  %v1091_v52 = vld [vmem:[%s2029_s4 + $0xd0] sm:$0xff] }
0x116d   :  { %1503 = vmatpush3.bf16.msra.mxu1 %v1502_v56 }
0x123f   :  { %v912_v53 = vpop.f32.mrb[4].mxu1 }
0x1240   :  { %v916_v55 = vadd.f32 %v912_v53, %v1788_v60  ;;  %v1428_v57 = vpop.f32.mrb[5].mxu1  ;;  %v1092_v53 = vld [vmem:[%s2029_s4 + $0xd8] sm:$0xff] }
0x1241   :  { %v1520_v57 = vpack.c.bf16 %v1092_v53, %v1091_v52 }
0x1242   :  { %v1232_v61 = vmul.f32 -1.442695, %v916_v55 }
0x1244   :  { %1603 = vpow2.f32 %v1232_v61  ;;  %v1075_v61 = vld [vmem:[%s2029_s4 + $0x50] sm:$0xff] }
0x1245   :  { %1605 = vtanh.f32 %v916_v55 }
0x124e   :  { %v1604_v62 = vpop.eup %1603 }
0x124f   :  { %v921_v63 = vadd.f32 1.0, %v1604_v62  ;;  %v1606_v0 = vpop.eup %1605  ;;  %v1076_v62 = vld [vmem:[%s2029_s4 + $0x58] sm:$0xff] }
0x1251   :  { %1607 = vrcp.f32 %v921_v63  ;;  %v1522_v63 = vpack.c.bf16 %v1076_v62, %v1075_v61 }
0x125b   :  { %v1608_v1 = vpop.eup %1607 }
0x125c   :  { %v924_v2 = vsel %vm1792_vm13, %v1606_v0, %v1608_v1  ;;  %v1093_v1 = vld [vmem:[%s2029_s4 + $0xe0] sm:$0xff] }
0x125d   :  { %927 = vrot.lane.b32.xlu0 %v924_v2, %s1625_s3  ;;  %v925_v6 = vmul.f32 %v924_v2, %v834_v47  ;;  %v1514_v47 = vpack.c.bf16 %v1072_v26, %v1071_v15 }
0x12cf   :  { %v928_v3 = vpop.permute.xlu0 %927 }
0x12d0   :  { %v930_v5 = vmul.f32 %v928_v3, %v924_v2 }
0x12d2   :  { %932 = vrot.lane.b32.xlu1 %v930_v5, %s1626_s10 }
0x1344   :  { %v933_v60 = vpop.permute.xlu1 %932 }
0x1345   :  { %v1890_v7 = vadd.f32 %v933_v60, %v925_v6  ;;  %v1077_v6 = vld [vmem:[%s2029_s4 + $0x60] sm:$0xff]  ;;  %v1078_v60 = vld [vmem:[%s2029_s4 + $0x68] sm:$0xff] }
0x1347   :  { %1609 = vtanh.f32 %v1890_v7 }
0x1351   :  { %v1610_v8 = vpop.eup %1609 }
0x1352   :  { %938 = vrot.lane.b32.xlu0 %v1610_v8, %s1625_s3 }
0x13c4   :  { %v939_v9 = vpop.permute.xlu0 %938 }
0x13c5   :  { %v1894_v10 = vmul.f32 %v939_v9, %v924_v2  ;;  %v1094_v2 = vld [vmem:[%s2029_s4 + $0xe8] sm:$0xff]  ;;  %v1095_v9 = vld [vmem:[%s2029_s4 + $0xf0] sm:$0xff] }
0x13c6   :  { %v1524_v5 = vpack.c.bf16 %v1094_v2, %v1093_v1 }
0x13c7   :  { %943 = vrot.lane.b32.xlu1 %v1894_v10, %s1626_s10 }
0x1439   :  { %v944_v50 = vpop.permute.xlu1 %943 }
0x143a   :  { %1438 = vmatmul.mubr.msk.f32.vlgmr.msra.gmra.mrb[16].mxu0 %vm236_vm14, %v944_v50  ;;  %v1096_v50 = vld [vmem:[%s2029_s4 + $0xf8] sm:$0xff] }
0x150d   :  { %v1013_v11 = vpop.f32.mrb[16].mxu0 }
0x150e   :  { %v1017_v12 = vadd.f32 %v1013_v11, %v1786_v58  ;;  %v1439_v13 = vpop.f32.mrb[17].mxu0  ;;  %v1545_v58 = vpack.i.bf16 %v1817_v37, %v840_v51  ;;  %v1083_v37 = vld [vmem:[%s2029_s4 + $0x90] sm:$0xff]  ;;  %v1074_v51 = vld [vmem:[%s2029_s4 + $0x48] sm:$0xff]  ;;  %v1528_v11 = vpack.c.bf16 %v1096_v50, %v1095_v9 }
0x150f   :  { %v1504_v33 = vpack.c.bf16 %v1084_v32, %v1083_v37  ;;  %v1518_v55 = vpack.c.bf16 %v1074_v51, %v1073_v49  ;;  %v1080_v13 = vld [vmem:[%s2029_s4 + $0x78] sm:$0xff] }
0x1510   :  { %v1234_v16 = vmul.f32 -1.442695, %v1017_v12 }
0x1511   :  { %1505 = vmatprep.subr.bf16.mxu1 %v1504_v33  ;;  %v1235_v33 = vld [vmem:[%s2030_s5] ss:$0 sm:$0xff] }
0x1512   :  { %1611 = vpow2.f32 %v1234_v16  ;;  %1507 = vmatpush3.bf16.msra.mxu1 %v1506_v40 }
0x1513   :  { %1613 = vtanh.f32 %v1017_v12  ;;  %1509 = vmatprep.subr.bf16.mxu1 %v1508_v41  ;;  %v1079_v12 = vld [vmem:[%s2029_s4 + $0x70] sm:$0xff] }
0x1514   :  { %v1530_v16 = vpack.c.bf16 %v1080_v13, %v1079_v12 }
0x1516   :  { %1511 = vmatpush3.bf16.msra.mxu1 %v1510_v46 }
0x1517   :  { %1513 = vmatprep.subr.bf16.mxu1 %v1512_v19 }
0x151a   :  { %1515 = vmatpush3.bf16.msra.mxu1 %v1514_v47 }
0x151b   :  { %1517 = vmatprep.subr.bf16.mxu1 %v1516_v48 }
0x151c   :  { %v1612_v18 = vpop.eup %1611 }
0x151d   :  { %v1022_v20 = vadd.f32 1.0, %v1612_v18  ;;  %v1614_v21 = vpop.eup %1613 }
0x151e   :  { %1519 = vmatpush3.bf16.msra.mxu1 %v1518_v55 }
0x151f   :  { %1615 = vrcp.f32 %v1022_v20  ;;  %1521 = vmatprep.subr.bf16.mxu1 %v1520_v57  ;;  %v1550_v20 = vpack.i.bf16 %v1834_v59, %v1894_v10 }
0x1522   :  { %1523 = vmatpush3.bf16.msra.mxu1 %v1522_v63 }
0x1523   :  { %1525 = vmatprep.subr.bf16.mxu1 %v1524_v5 }
0x1529   :  { %v1616_v22 = vpop.eup %1615 }
0x152a   :  { %v1902_v23 = vsel %vm1792_vm13, %v1614_v21, %v1616_v22 }
0x152b   :  { %1028 = vrot.lane.b32.xlu0 %v1902_v23, %s1625_s3  ;;  %v1026_v0 = vmul.f32 %v1902_v23, %v1890_v7  ;;  %v1526_v7 = vpack.c.bf16 %v1078_v60, %v1077_v6 }
0x152d   :  { %1527 = vmatpush3.bf16.msra.mxu1 %v1526_v7 }
0x152e   :  { %1529 = vmatprep.subr.bf16.mxu1 %v1528_v11 }
0x1531   :  { %1531 = vmatpush3.bf16.msra.mxu1 %v1530_v16 }
0x159d   :  { %v1029_v24 = vpop.permute.xlu0 %1028 }
0x159e   :  { %v1031_v27 = vmul.f32 %v1029_v24, %v1902_v23 }
0x15a0   :  { %1033 = vrot.lane.b32.xlu1 %v1031_v27, %s1626_s10 }
0x15a4   :  { %1546 = vrot.lane.b32.xlu1 %v1545_v58, %s1625_s3 }
0x1612   :  { %v1034_v3 = vpop.permute.xlu1 %1033 }
0x1613   :  { %v1036_v8 = vadd.f32 %v1034_v3, %v1026_v0 }
0x1615   :  { %1617 = vtanh.f32 %v1036_v8 }
0x1616   :  { %v1547_v21 = vpop.permute.xlu1 %1546 }
0x1617   :  { %v1549_v24 = vunpack.i.h.bf16 %v1547_v21  ;;  %v1548_v27 = vunpack.i.l.bf16 %v1547_v21 }
0x1619   :  { %v1057_v29 = vsel %vm236_vm14, %v1802_v17, %v1549_v24  ;;  %v1062_v59 = vsel %vm236_vm14, %v1868_v38, %v1548_v27 }
0x161f   :  { %v1618_v18 = vpop.eup %1617 }
0x1620   :  { %1039 = vrot.lane.b32.xlu0 %v1618_v18, %s1625_s3 }
0x1624   :  { %1551 = vrot.lane.b32.xlu0 %v1550_v20, %s1627_s21 }
0x1692   :  { %v1040_v22 = vpop.permute.xlu0 %1039 }
0x1693   :  { %v1042_v30 = vmul.f32 %v1040_v22, %v1902_v23 }
0x1696   :  { %v1552_v58 = vpop.permute.xlu0 %1551 }
0x1697   :  { %v1554_v28 = vunpack.i.h.bf16 %v1552_v58  ;;  %v1553_v4 = vunpack.i.l.bf16 %v1552_v58 }
0x1699   :  { %v1063_v10 = vsel %vm1058_vm15, %v1062_v59, %v1553_v4  ;;  %v1059_v31 = vsel %vm1058_vm15, %v1057_v29, %v1554_v28 }
0x169a   :  { %v1064_v37 = vsel %vm1060_vm0, %v1063_v10, %v1042_v30  ;;  %v1061_v32 = vsel %vm1060_vm0, %v1059_v31, %v1851_v14 }
0x169b   :  { %1168 = vmatprep.mubr.f32.mxu1 %v1064_v37 }
0x169c   :  { %1169 = vmatmul.mubr.f32.vlgmr.msra.gmra.mrb[6].mxu1 %v1061_v32 }
0x176f   :  { %v1323_v56 = vpop.f32.mrb[6].mxu1 }
0x1770   :  { %v1324_v34 = vpop.f32.mrb[7].mxu1 }
0x1771   :  { %v1325_v35 = vadd.f32 %v1324_v34, %v1323_v56 }
0x1773   :  { %v1171_v17 = vadd.f32 %v1325_v35, %v1235_v33 }
0x1775   :  { %1619 = vtanh.f32 %v1171_v17 }
0x177f   :  { %v1620_v23 = vpop.eup %1619 }
0x1780   :  { %1180 = vrot.lane.b32.xlu0 %v1620_v23, %s1628_s22  ;;  %1176 = vrot.lane.b32.xlu1 %v1620_v23, %s1629_s23 }
0x1784   :  { %1188 = vrot.lane.b32.xlu0 %v1620_v23, %s1627_s21  ;;  %1184 = vrot.lane.b32.xlu1 %v1620_v23, %s1630_s24 }
0x1788   :  { %1192 = vrot.lane.b32.xlu1 %v1620_v23, %s1631_s25 }
0x17f2   :  { %v1181_v14 = vpop.permute.xlu0 %1180  ;;  %v1177_v38 = vpop.permute.xlu1 %1176 }
0x17f3   :  { %v1179_v36 = vmax.f32 %v1620_v23, %v1177_v38 }
0x17f5   :  { %v1183_v39 = vmax.f32 %v1179_v36, %v1181_v14 }
0x17f6   :  { %v1185_v40 = vpop.permute.xlu1 %1184  ;;  %v1189_v42 = vpop.permute.xlu0 %1188 }
0x17f7   :  { %v1187_v41 = vmax.f32 %v1183_v39, %v1185_v40 }
0x17f9   :  { %v1191_v43 = vmax.f32 %v1187_v41, %v1189_v42 }
0x17fa   :  { %v1193_v44 = vpop.permute.xlu1 %1192 }
0x17fb   :  { %v1195_v45 = vmax.f32 %v1191_v43, %v1193_v44 }
0x17fd   :  { %1197 = vst.msk [vmem:[%s2031_s6] sm:$0xff] %vm1196_vm1, %v1195_v45 }

</bundles_post_ra>
